<compile_context>
chip_gen: v6e
topology: v6e:2x2x1
jax: 0.10.0
libtpu: 0.0.40
codegen_flags: <defaults>
</compile_context>

<pallas_src>
import jax
import jax.numpy as jnp
from jax.experimental import pallas as pl
from jax.experimental.pallas import tpu as pltpu


def _round_up(x, m):
    return (x + m - 1) // m * m


def _cdiv(a, b):
    return -(-a // b)


def _vmem_capacity_bytes():
    """Per-core VMEM capacity; conservative fallback if the query fails."""
    try:
        info = pltpu.get_tpu_info()
        cap = getattr(info, "vmem_capacity_bytes", None)
        if cap:
            return int(cap)
    except Exception:
        pass
    return 64 << 20  # v7x per-TC size; safe lower bound for v5e/v6e (128 MiB)


# --------------------------------------------------------------------------
# Kernels
# --------------------------------------------------------------------------
def _ffn_kernel_resident(x_ref, w1_ref, b1_ref, w2_ref, b2_ref, o_ref):
    """Weights fully resident in VMEM; grid = (row tiles,). No accumulator."""
    x = x_ref[...].astype(jnp.bfloat16)
    h = jnp.dot(x, w1_ref[...], preferred_element_type=jnp.float32)
    h = jnp.maximum(h + b1_ref[...], 0.0)
    # Dropout: identity (eval mode).
    out = jnp.dot(h.astype(jnp.bfloat16), w2_ref[...],
                  preferred_element_type=jnp.float32)
    o_ref[...] = (out + b2_ref[...]).astype(o_ref.dtype)


def _ffn_kernel_tiled(x_ref, w1_ref, b1_ref, w2_ref, b2_ref, o_ref, acc_ref):
    """Grid: (row tiles, d_ff tiles). d_ff axis is a reduction for matmul 2."""
    j = pl.program_id(1)

    @pl.when(j == 0)
    def _init():
        acc_ref[...] = jnp.zeros_like(acc_ref)

    x = x_ref[...].astype(jnp.bfloat16)
    h = jnp.dot(x, w1_ref[...], preferred_element_type=jnp.float32)
    h = jnp.maximum(h + b1_ref[...], 0.0)
    # Dropout: identity (eval mode).
    acc_ref[...] += jnp.dot(h.astype(jnp.bfloat16), w2_ref[...],
                            preferred_element_type=jnp.float32)

    @pl.when(j == pl.num_programs(1) - 1)
    def _finalize():
        o_ref[...] = (acc_ref[...] + b2_ref[...]).astype(o_ref.dtype)


# --------------------------------------------------------------------------
# Wrapper
# --------------------------------------------------------------------------
def positionwise_feed_forward(x, w1, b1, w2, b2, *, tm=512, tf=1024):
    """FFN forward.

    x:  [..., d_model]
    w1: [d_model, d_ff]   (transposed nn.Linear(d_model, d_ff).weight)
    b1: [d_ff]
    w2: [d_ff, d_model]   (transposed nn.Linear(d_ff, d_model).weight)
    b2: [d_model]
    """
    orig_shape = x.shape
    d_model = orig_shape[-1]
    d_ff = w1.shape[1]
    x2d = x.reshape(-1, d_model)
    M = x2d.shape[0]

    x_item = x2d.dtype.itemsize
    out_item = x_item

    d_model_p = _round_up(d_model, 128)
    d_ff_128 = _round_up(d_ff, 128)

    vmem_cap = _vmem_capacity_bytes()
    cap = int(vmem_cap * 0.8)  # leave headroom for Mosaic scratch/semaphores

    # ---- row tiling: minimize padding waste, keep the MXU pass full --------
    MIN_ROW_TILE = 256
    ni = max(1, _cdiv(M, tm))
    tm_eff = _round_up(_cdiv(M, ni), 8)
    tm_eff = max(tm_eff, min(MIN_ROW_TILE, _round_up(tm, 8)))
    # Prefer >=2 row tiles when rows allow (megacore sharding on v7x).
    if ni == 1 and tm_eff >= 2 * MIN_ROW_TILE and M > MIN_ROW_TILE:
        tm_eff = max(_round_up(_cdiv(M, 2), 8), MIN_ROW_TILE)

    def footprint(tm_e, tf_e, resident):
        fp = (2 * tm_e * d_model_p * x_item          # x tiles (double buffered)
              + 2 * tm_e * d_model_p * out_item      # out tiles
              + 2 * d_model_p * tf_e * 2             # W1 tiles (bf16, 2 bufs)
              + 2 * tf_e * d_model_p * 2             # W2 tiles (bf16, 2 bufs)
              + 2 * (tf_e + d_model_p) * 4           # bias tiles (f32)
              + tm_e * tf_e * 6)                     # h intermediate (f32+bf16)
        if not resident:
            fp += tm_e * d_model_p * 4               # f32 accumulator scratch
        return fp

    # ---- residency decision: hold W1/W2 whole in VMEM whenever they fit ----
    resident = False
    tm_try = tm_eff
    while tm_try >= 8:
        if footprint(tm_try, d_ff_128, True) <= cap:
            resident = True
            tm_eff = tm_try
            break
        nxt = _round_up(tm_try // 2, 8)
        if nxt >= tm_try:
            break
        tm_try = nxt

    if resident:
        nj = 1
        tf_eff = d_ff_128
        d_ff_p = d_ff_128
    else:
        # Fallback: tile d_ff; size tiles as ceil-div to minimize pad waste.
        nj = max(1, _cdiv(d_ff_128, tf))
        tf_eff = _round_up(_cdiv(d_ff_128, nj), 128)
        d_ff_p = nj * tf_eff
        for _ in range(8):
            if footprint(tm_eff, tf_eff, False) <= cap:
                break
            if tm_eff > 64:
                tm_eff = max(64, _round_up(tm_eff // 2, 8))
            elif tf_eff > 128:
                tf_eff = max(128, _round_up(tf_eff // 2, 128))
                nj = _cdiv(d_ff_128, tf_eff)
                d_ff_p = nj * tf_eff
            else:
                break

    ni = _cdiv(M, tm_eff)
    M_p = ni * tm_eff

    # ---- operand prep (skip pads/casts when already aligned) ---------------
    pad_r, pad_c = M_p - M, d_model_p - d_model
    x_p = x2d if (pad_r == 0 and pad_c == 0) else jnp.pad(
        x2d, ((0, pad_r), (0, pad_c)))

    def _prep_w(w, rows, cols):
        pr, pc = rows - w.shape[0], cols - w.shape[1]
        if pr or pc:
            w = jnp.pad(w, ((0, pr), (0, pc)))
        return w if w.dtype == jnp.bfloat16 else w.astype(jnp.bfloat16)

    # Static parameters: under jit these pads/casts are hoisted/constant-folded
    # out of the per-call path.
    w1_p = _prep_w(w1, d_model_p, d_ff_p)
    w2_p = _prep_w(w2, d_ff_p, d_model_p)
    b1_p = (b1 if b1.shape[0] == d_ff_p
            else jnp.pad(b1, (0, d_ff_p - d_ff))).astype(jnp.float32)
    b1_p = b1_p.reshape(1, d_ff_p)
    b2_p = (b2 if b2.shape[0] == d_model_p
            else jnp.pad(b2, (0, d_model_p - d_model))).astype(jnp.float32)
    b2_p = b2_p.reshape(1, d_model_p)

    # ---- VMEM budget & cost estimate (padded shapes, real re-stream count) --
    fp = footprint(tm_eff, tf_eff, resident)
    vmem_limit = int(min(cap, max(fp * 3 // 2 + (2 << 20), 32 << 20)))

    flops = 4 * M_p * d_model_p * d_ff_p              # two matmuls
    weight_passes = 1 if resident else ni             # HBM weight re-streams
    bytes_accessed = int(
        M_p * d_model_p * (x_item + out_item)
        + weight_passes * (w1_p.size + w2_p.size) * 2
        + b1_p.size * 4 + b2_p.size * 4)
    cost = pl.CostEstimate(flops=flops, transcendentals=0,
                           bytes_accessed=bytes_accessed)

    if resident:
        out2d = pl.pallas_call(
            _ffn_kernel_resident,
            out_shape=jax.ShapeDtypeStruct((M_p, d_model_p), x.dtype),
            grid_spec=pltpu.PrefetchScalarGridSpec(
                num_scalar_prefetch=0,
                grid=(ni,),
                in_specs=[
                    pl.BlockSpec((tm_eff, d_model_p), lambda i: (i, 0)),  # x
                    pl.BlockSpec((d_model_p, d_ff_p), lambda i: (0, 0)),  # W1
                    pl.BlockSpec((1, d_ff_p), lambda i: (0, 0)),          # b1
                    pl.BlockSpec((d_ff_p, d_model_p), lambda i: (0, 0)),  # W2
                    pl.BlockSpec((1, d_model_p), lambda i: (0, 0)),       # b2
                ],
                out_specs=pl.BlockSpec((tm_eff, d_model_p), lambda i: (i, 0)),
            ),
            compiler_params=pltpu.CompilerParams(
                dimension_semantics=("parallel",),
                vmem_limit_bytes=vmem_limit,
            ),
            cost_estimate=cost,
        )(x_p, w1_p, b1_p, w2_p, b2_p)
    else:
        out2d = pl.pallas_call(
            _ffn_kernel_tiled,
            out_shape=jax.ShapeDtypeStruct((M_p, d_model_p), x.dtype),
            grid_spec=pltpu.PrefetchScalarGridSpec(
                num_scalar_prefetch=0,
                grid=(ni, nj),
                in_specs=[
                    pl.BlockSpec((tm_eff, d_model_p), lambda i, j: (i, 0)),
                    pl.BlockSpec((d_model_p, tf_eff), lambda i, j: (0, j)),
                    pl.BlockSpec((1, tf_eff), lambda i, j: (0, j)),
                    pl.BlockSpec((tf_eff, d_model_p), lambda i, j: (j, 0)),
                    pl.BlockSpec((1, d_model_p), lambda i, j: (0, 0)),
                ],
                out_specs=pl.BlockSpec((tm_eff, d_model_p),
                                       lambda i, j: (i, 0)),
                scratch_shapes=[pltpu.VMEM((tm_eff, d_model_p), jnp.float32)],
            ),
            compiler_params=pltpu.CompilerParams(
                dimension_semantics=("parallel", "arbitrary"),
                vmem_limit_bytes=vmem_limit,
            ),
            cost_estimate=cost,
        )(x_p, w1_p, b1_p, w2_p, b2_p)

    if M_p == M and d_model_p == d_model:
        return out2d.reshape(orig_shape)
    return out2d[:M, :d_model].reshape(orig_shape)


if __name__ == "__main__":
    # Small, deterministic problem: B=2, S=8, d_model=32, d_ff=64
    B, S, d_model, d_ff = 2, 8, 32, 64
    key = jax.random.PRNGKey(0)
    kx, kw1, kb1, kw2, kb2 = jax.random.split(key, 5)

    x = jax.random.normal(kx, (B, S, d_model), dtype=jnp.float32)
    # nn.Linear(d_model, d_ff): weight is (d_ff, d_model); stored transposed
    # as (d_model, d_ff) so the kernel computes x @ W1 directly.
    w1 = jax.random.normal(kw1, (d_model, d_ff), dtype=jnp.float32) * 0.1
    b1 = jax.random.normal(kb1, (d_ff,), dtype=jnp.float32) * 0.1
    w2 = jax.random.normal(kw2, (d_ff, d_model), dtype=jnp.float32) * 0.1
    b2 = jax.random.normal(kb2, (d_model,), dtype=jnp.float32) * 0.1

    out = positionwise_feed_forward(x, w1, b1, w2, b2)
    out = jax.block_until_ready(out)

    # Pure-JAX f32 reference (PyTorch module in eval mode).  Tolerance is
    # loosened because the kernel uses bf16 MXU operands with f32 accumulate.
    ref = jnp.maximum(x @ w1 + b1, 0.0) @ w2 + b2
    assert out.shape == (B, S, d_model)
    assert jnp.allclose(out, ref, atol=5e-2, rtol=5e-2), (
        float(jnp.max(jnp.abs(out - ref))))

    print("KERNEL_OK")
</pallas_src>

<mosaic_0001>
module attributes {stable_mosaic.version = 11 : i64} {
  func.func @_ffn_kernel_resident(%arg0: i32, %arg1: memref<256x128xf32, #tpu.memory_space<vmem>>, %arg2: memref<128x128xbf16, #tpu.memory_space<vmem>>, %arg3: memref<1x128xf32, #tpu.memory_space<vmem>>, %arg4: memref<128x128xbf16, #tpu.memory_space<vmem>>, %arg5: memref<1x128xf32, #tpu.memory_space<vmem>>, %arg6: memref<256x128xf32, #tpu.memory_space<vmem>>) attributes {dimension_semantics = [#tpu.dimension_semantics<parallel>], iteration_bounds = array<i64: 1>, scalar_prefetch = 0 : i64, scratch_operands = 0 : i64, tpu.core_type = #tpu.core_type<tc>, window_params = [{transform_indices = @transform_0, window_bounds = array<i64: 256, 128>}, {pipeline_mode = #tpu.pipeline_mode<synchronous>, transform_indices = @transform_1, window_bounds = array<i64: 128, 128>}, {pipeline_mode = #tpu.pipeline_mode<synchronous>, transform_indices = @transform_2, window_bounds = array<i64: 1, 128>}, {pipeline_mode = #tpu.pipeline_mode<synchronous>, transform_indices = @transform_3, window_bounds = array<i64: 128, 128>}, {pipeline_mode = #tpu.pipeline_mode<synchronous>, transform_indices = @transform_4, window_bounds = array<i64: 1, 128>}, {transform_indices = @transform_5, window_bounds = array<i64: 256, 128>}]} {
    %c0 = arith.constant 0 : index
    %c0_0 = arith.constant 0 : index
    %0 = vector.load %arg1[%c0, %c0_0] : memref<256x128xf32, #tpu.memory_space<vmem>>, vector<256x128xf32>
    %1 = arith.truncf %0 : vector<256x128xf32> to vector<256x128xbf16>
    %c0_1 = arith.constant 0 : index
    %c0_2 = arith.constant 0 : index
    %2 = vector.load %arg2[%c0_1, %c0_2] : memref<128x128xbf16, #tpu.memory_space<vmem>>, vector<128x128xbf16>
    %cst = arith.constant dense<0.000000e+00> : vector<256x128xf32>
    %3 = tpu.matmul %1, %2, %cst {dimension_numbers = #tpu.dot_dimension_numbers<[1], [0], [0], [1], [0, 0, 1, 1], [], []>} : vector<256x128xbf16>, vector<128x128xbf16>, vector<256x128xf32> -> vector<256x128xf32>
    %c0_3 = arith.constant 0 : index
    %c0_4 = arith.constant 0 : index
    %4 = vector.load %arg3[%c0_3, %c0_4] : memref<1x128xf32, #tpu.memory_space<vmem>>, vector<1x128xf32>
    %5 = vector.broadcast %4 : vector<1x128xf32> to vector<256x128xf32>
    %6 = arith.addf %3, %5 : vector<256x128xf32>
    %cst_5 = arith.constant 0.000000e+00 : f32
    %7 = vector.broadcast %cst_5 : f32 to vector<256x128xf32>
    %8 = arith.maximumf %6, %7 : vector<256x128xf32>
    %9 = arith.truncf %8 : vector<256x128xf32> to vector<256x128xbf16>
    %c0_6 = arith.constant 0 : index
    %c0_7 = arith.constant 0 : index
    %10 = vector.load %arg4[%c0_6, %c0_7] : memref<128x128xbf16, #tpu.memory_space<vmem>>, vector<128x128xbf16>
    %cst_8 = arith.constant dense<0.000000e+00> : vector<256x128xf32>
    %11 = tpu.matmul %9, %10, %cst_8 {dimension_numbers = #tpu.dot_dimension_numbers<[1], [0], [0], [1], [0, 0, 1, 1], [], []>} : vector<256x128xbf16>, vector<128x128xbf16>, vector<256x128xf32> -> vector<256x128xf32>
    %c0_9 = arith.constant 0 : index
    %c0_10 = arith.constant 0 : index
    %12 = vector.load %arg5[%c0_9, %c0_10] : memref<1x128xf32, #tpu.memory_space<vmem>>, vector<1x128xf32>
    %13 = vector.broadcast %12 : vector<1x128xf32> to vector<256x128xf32>
    %14 = arith.addf %11, %13 : vector<256x128xf32>
    %c0_11 = arith.constant 0 : index
    %c0_12 = arith.constant 0 : index
    %15 = vector.load %arg6[%c0_11, %c0_12] : memref<256x128xf32, #tpu.memory_space<vmem>>, vector<256x128xf32>
    tpu.vector_store %arg6[%c0_11, %c0_12], %14 {strides = array<i32>} : memref<256x128xf32, #tpu.memory_space<vmem>>, vector<256x128xf32>,
    return
  }
  func.func @transform_0(%arg0: i32) -> (i32, i32) {
    %c0_i32 = arith.constant 0 : i32
    %c0_i32_0 = arith.constant 0 : i32
    return %arg0, %c0_i32 : i32, i32
  }
  func.func @transform_1(%arg0: i32) -> (i32, i32) {
    %c0_i32 = arith.constant 0 : i32
    %c0_i32_0 = arith.constant 0 : i32
    %c0_i32_1 = arith.constant 0 : i32
    return %c0_i32, %c0_i32_0 : i32, i32
  }
  func.func @transform_2(%arg0: i32) -> (i32, i32) {
    %c0_i32 = arith.constant 0 : i32
    %c0_i32_0 = arith.constant 0 : i32
    %c0_i32_1 = arith.constant 0 : i32
    return %c0_i32, %c0_i32_0 : i32, i32
  }
  func.func @transform_3(%arg0: i32) -> (i32, i32) {
    %c0_i32 = arith.constant 0 : i32
    %c0_i32_0 = arith.constant 0 : i32
    %c0_i32_1 = arith.constant 0 : i32
    return %c0_i32, %c0_i32_0 : i32, i32
  }
  func.func @transform_4(%arg0: i32) -> (i32, i32) {
    %c0_i32 = arith.constant 0 : i32
    %c0_i32_0 = arith.constant 0 : i32
    %c0_i32_1 = arith.constant 0 : i32
    return %c0_i32, %c0_i32_0 : i32, i32
  }
  func.func @transform_5(%arg0: i32) -> (i32, i32) {
    %c0_i32 = arith.constant 0 : i32
    %c0_i32_0 = arith.constant 0 : i32
    return %arg0, %c0_i32 : i32, i32
  }
}

</mosaic_0001>

<bundles_post_ra>
// kernel: tpu_custom_call.1
= control target key start
LH: loop header
LB: loop body
LE: loop exit
PB: predicated region body
PF: predicated region fallthrough
CT: control target
= control target key end

     0   :  { %10 = vsyncpa [#allocation3], 0  ;;  %s1075_s0 = inlined_call_operand.hbm [shape: f32[256,128], index: 0, kind: input, shape index: {}]   ;;  %s1076_s1 = inlined_call_operand.hbm [shape: bf16[128,128], index: 1, kind: input, shape index: {}]   ;;  %s1077_s2 = inlined_call_operand.vmem [shape: f32[1,128], index: 2, kind: input, shape index: {}]   ;;  %s1078_s3 = inlined_call_operand.hbm [shape: bf16[128,128], index: 3, kind: input, shape index: {}]   ;;  %s1079_s4 = inlined_call_operand.vmem [shape: f32[1,128], index: 4, kind: input, shape index: {}]   ;;  %s1080_s5 = inlined_call_operand.hbm [shape: f32[256,128], index: 5, kind: output, shape index: {}]  }
   0x1   :  { %11 = vsyncpa [#allocation6], 0 }
   0x2   :  { %12 = vsyncpa [#allocation4], 0  ;;  %s945_s18 = smov [#allocation5]  }
   0x3   :  { %s30_s19 = sshll.u32 %s945_s18, 4  ;;  %s31_s19 = int_to_ptr.vmem [resolvable:$true] %s30_s19 }
   0x4   :  { %s867_s20 = scalar_lea.vmem %s31_s19, 1024  ;;  %p872_p1 = scmp.lt.s32.totalorder %s31_s19, %s31_s19 }
   0x5   :  { %p868_p0 = scmp.ne.s32.totalorder %s31_s19, %s867_s20  ;;  %p873_p2 = scmp.lt.s32.totalorder %s867_s20, %s867_s20 }
   0x7   :  { %p874_p3 = por %p873_p2, %p872_p1 }
   0x9   :  { %p875_p4 = pnand %p874_p3, %p868_p0 }
   0xb   :  { %878 = shalt.err (!%p875_p4)
}
   0xc   :  { %s946_s21 = smov 64   ;;  %s947_s22 = smov 4  }
   0xd   :  { %36 = dma.hbm_to_vmem [thread:$0]  %s1076_s1, 1024, %s31_s19, [#allocation6], %s946_s21, %s946_s21, %s947_s22  }
   0xe   :  { %s948_s25 = smov [#allocation2]  }
   0xf   :  { %s18_s26 = sshll.u32 %s948_s25, 4  ;;  %s19_s26 = int_to_ptr.vmem [resolvable:$true] %s18_s26 }
  0x10   :  { %s887_s27 = scalar_lea.vmem %s19_s26, 4096  ;;  %p892_p6 = scmp.lt.s32.totalorder %s19_s26, %s19_s26 }
  0x11   :  { %p888_p5 = scmp.ne.s32.totalorder %s19_s26, %s887_s27  ;;  %p893_p7 = scmp.lt.s32.totalorder %s887_s27, %s887_s27 }
  0x13   :  { %p894_p8 = por %p893_p7, %p892_p6 }
  0x15   :  { %p895_p9 = pnand %p894_p8, %p888_p5 }
  0x17   :  { %898 = shalt.err (!%p895_p9)
}
  0x18   :  { %s949_s28 = smov 128   ;;  %s950_s29 = smov 8  }
  0x19   :  { %24 = dma.hbm_to_vmem [thread:$0]  %s1075_s0, 4096, %s19_s26, [#allocation3], %s949_s28, %s949_s28, %s950_s29  }
  0x1a   :  { %s951_s1 = smov [#allocation7]  }
  0x1b   :  { %s44_s7 = sshll.u32 %s951_s1, 4  ;;  %s45_s7 = int_to_ptr.vmem [resolvable:$true] %s44_s7 }
  0x1c   :  { %s907_s8 = scalar_lea.vmem %s45_s7, 1024  ;;  %p912_p11 = scmp.lt.s32.totalorder %s45_s7, %s45_s7 }
  0x1d   :  { %p908_p10 = scmp.ne.s32.totalorder %s45_s7, %s907_s8  ;;  %p913_p12 = scmp.lt.s32.totalorder %s907_s8, %s907_s8 }
  0x1f   :  { %p914_p13 = por %p913_p12, %p912_p11 }
  0x21   :  { %p915_p0 = pnand %p914_p13, %p908_p10 }
  0x23   :  { %918 = shalt.err (!%p915_p0)
}
  0x24   :  { %50 = dma.hbm_to_vmem [thread:$0]  %s1078_s3, 1024, %s45_s7, [#allocation6], %s946_s21, %s946_s21, %s947_s22  }
  0x25   :  { %939 = dma.done.wait [#allocation3], 4096  }
  0x26   :  { %940 = vsyncadd [#allocation3], 4294963200 }
  0x27   :  { %941 = dma.done.wait [#allocation6], 2048  }
  0x28   :  { %942 = vsyncadd [#allocation6], 4294965248  ;;  %v843_v0 = vld [vmem:[#allocation5 + $0x38] sm:$0xff]   ;;  %v844_v1 = vld [vmem:[#allocation5 + $0x30] sm:$0xff]  }
  0x29   :  { %739 = vmatprep.subr.bf16.mxu0 %v843_v0  ;;  %v845_v2 = vld [vmem:[#allocation5 + $0x28] sm:$0xff]   ;;  %v846_v3 = vld [vmem:[#allocation5 + $0x20] sm:$0xff]   ;;  %v847_v7 = vld [vmem:[#allocation5 + $0x18] sm:$0xff]  }
  0x2a   :  { %740 = vmatpush3.bf16.msra.mxu0 %v843_v0  ;;  %v63_v4 = vld [vmem:[#allocation2] sm:$0xff]  ;;  %v64_v5 = vld [vmem:[#allocation2 + $0x8] sm:$0xff]  ;;  %v848_v8 = vld [vmem:[#allocation5 + $0x10] sm:$0xff]  }
  0x2b   :  { %741 = vmatprep.subr.bf16.mxu0 %v844_v1  ;;  %v95_v6 = vpack.c.bf16 %v64_v5, %v63_v4  ;;  %v849_v9 = vld [vmem:[#allocation5 + $0x8] sm:$0xff]   ;;  %v851_v10 = vld [vmem:[#allocation7 + $0x38] sm:$0xff]   ;;  %v852_v11 = vld [vmem:[#allocation7 + $0x30] sm:$0xff]  }
  0x2c   :  { %787 = vmatprep.subr.bf16.mxu1 %v851_v10  ;;  %v850_v12 = vld [vmem:[#allocation5] sm:$0xff]   ;;  %v853_v13 = vld [vmem:[#allocation7 + $0x28] sm:$0xff]   ;;  %v65_v14 = vld [vmem:[#allocation2 + $0x10] sm:$0xff] }
  0x2d   :  { %755 = vmatprep.mubr.bf16.mxu0 %v95_v6  ;;  %788 = vmatpush3.bf16.msra.mxu1 %v851_v10  ;;  %v66_v15 = vld [vmem:[#allocation2 + $0x18] sm:$0xff]  ;;  %v854_v16 = vld [vmem:[#allocation7 + $0x20] sm:$0xff]   ;;  %v68_v18 = vld [vmem:[#allocation2 + $0x28] sm:$0xff] }
  0x2e   :  { %742 = vmatpush3.bf16.msra.mxu0 %v844_v1  ;;  %789 = vmatprep.subr.bf16.mxu1 %v852_v11  ;;  %v67_v17 = vld [vmem:[#allocation2 + $0x20] sm:$0xff]  ;;  %v96_v19 = vpack.c.bf16 %v66_v15, %v65_v14  ;;  %v855_v21 = vld [vmem:[#allocation7 + $0x18] sm:$0xff]   ;;  %v69_v22 = vld [vmem:[#allocation2 + $0x30] sm:$0xff] }
  0x2f   :  { %743 = vmatprep.subr.bf16.mxu0 %v845_v2  ;;  %v97_v20 = vpack.c.bf16 %v68_v18, %v67_v17  ;;  %v70_v23 = vld [vmem:[#allocation2 + $0x38] sm:$0xff]  ;;  %v71_v24 = vld [vmem:[#allocation2 + $0x40] sm:$0xff]  ;;  %v72_v25 = vld [vmem:[#allocation2 + $0x48] sm:$0xff] }
  0x30   :  { %v98_v26 = vpack.c.bf16 %v70_v23, %v69_v22  ;;  %v99_v27 = vpack.c.bf16 %v72_v25, %v71_v24  ;;  %v73_v28 = vld [vmem:[#allocation2 + $0x50] sm:$0xff]  ;;  %v74_v29 = vld [vmem:[#allocation2 + $0x58] sm:$0xff]  ;;  %v75_v30 = vld [vmem:[#allocation2 + $0x60] sm:$0xff] }
  0x31   :  { %790 = vmatpush3.bf16.msra.mxu1 %v852_v11  ;;  %v76_v31 = vld [vmem:[#allocation2 + $0x68] sm:$0xff]  ;;  %v100_v32 = vpack.c.bf16 %v74_v29, %v73_v28  ;;  %v77_v34 = vld [vmem:[#allocation2 + $0x70] sm:$0xff]  ;;  %v78_v35 = vld [vmem:[#allocation2 + $0x78] sm:$0xff] }
  0x32   :  { %744 = vmatpush3.bf16.msra.mxu0 %v845_v2  ;;  %791 = vmatprep.subr.bf16.mxu1 %v853_v13  ;;  %v101_v33 = vpack.c.bf16 %v76_v31, %v75_v30  ;;  %v79_v36 = vld [vmem:[#allocation2 + $0x80] sm:$0xff]  ;;  %v80_v37 = vld [vmem:[#allocation2 + $0x88] sm:$0xff]  ;;  %v102_v38 = vpack.c.bf16 %v78_v35, %v77_v34  ;;  %v81_v40 = vld [vmem:[#allocation2 + $0x90] sm:$0xff] }
  0x33   :  { %745 = vmatprep.subr.bf16.mxu0 %v846_v3  ;;  %v103_v39 = vpack.c.bf16 %v80_v37, %v79_v36  ;;  %v82_v41 = vld [vmem:[#allocation2 + $0x98] sm:$0xff]  ;;  %v83_v42 = vld [vmem:[#allocation2 + $0xa0] sm:$0xff]  ;;  %v84_v43 = vld [vmem:[#allocation2 + $0xa8] sm:$0xff] }
  0x34   :  { %v104_v44 = vpack.c.bf16 %v82_v41, %v81_v40  ;;  %v105_v45 = vpack.c.bf16 %v84_v43, %v83_v42  ;;  %v85_v46 = vld [vmem:[#allocation2 + $0xb0] sm:$0xff]  ;;  %v86_v47 = vld [vmem:[#allocation2 + $0xb8] sm:$0xff]  ;;  %v87_v48 = vld [vmem:[#allocation2 + $0xc0] sm:$0xff] }
  0x35   :  { %792 = vmatpush3.bf16.msra.mxu1 %v853_v13  ;;  %v88_v49 = vld [vmem:[#allocation2 + $0xc8] sm:$0xff]  ;;  %v106_v50 = vpack.c.bf16 %v86_v47, %v85_v46  ;;  %v89_v52 = vld [vmem:[#allocation2 + $0xd0] sm:$0xff]  ;;  %v90_v53 = vld [vmem:[#allocation2 + $0xd8] sm:$0xff] }
  0x36   :  { %746 = vmatpush3.bf16.msra.mxu0 %v846_v3  ;;  %793 = vmatprep.subr.bf16.mxu1 %v854_v16  ;;  %v107_v51 = vpack.c.bf16 %v88_v49, %v87_v48  ;;  %v91_v54 = vld [vmem:[#allocation2 + $0xe0] sm:$0xff]  ;;  %v92_v55 = vld [vmem:[#allocation2 + $0xe8] sm:$0xff]  ;;  %v108_v56 = vpack.c.bf16 %v90_v53, %v89_v52  ;;  %v93_v58 = vld [vmem:[#allocation2 + $0xf0] sm:$0xff] }
  0x37   :  { %747 = vmatprep.subr.bf16.mxu0 %v847_v7  ;;  %v109_v57 = vpack.c.bf16 %v92_v55, %v91_v54  ;;  %v94_v59 = vld [vmem:[#allocation2 + $0xf8] sm:$0xff]  ;;  %v856_v61 = vld [vmem:[#allocation7 + $0x10] sm:$0xff]   ;;  %v857_v62 = vld [vmem:[#allocation7 + $0x8] sm:$0xff]  }
  0x38   :  { %v110_v60 = vpack.c.bf16 %v94_v59, %v93_v58  ;;  %v858_v63 = vld [vmem:[#allocation7] sm:$0xff]  }
  0x39   :  { %794 = vmatpush3.bf16.msra.mxu1 %v854_v16  ;;  %v998_v2 = vld [vmem:[%s1077_s2] ss:$0 sm:$0xff] }
  0x3a   :  { %748 = vmatpush3.bf16.msra.mxu0 %v847_v7  ;;  %795 = vmatprep.subr.bf16.mxu1 %v855_v21 }
  0x3b   :  { %749 = vmatprep.subr.bf16.mxu0 %v848_v8 }
  0x3d   :  { %796 = vmatpush3.bf16.msra.mxu1 %v855_v21 }
  0x3e   :  { %750 = vmatpush3.bf16.msra.mxu0 %v848_v8  ;;  %797 = vmatprep.subr.bf16.mxu1 %v856_v61 }
  0x3f   :  { %751 = vmatprep.subr.bf16.mxu0 %v849_v9 }
  0x41   :  { %798 = vmatpush3.bf16.msra.mxu1 %v856_v61 }
  0x42   :  { %752 = vmatpush3.bf16.msra.mxu0 %v849_v9  ;;  %799 = vmatprep.subr.bf16.mxu1 %v857_v62 }
  0x43   :  { %753 = vmatprep.subr.bf16.mxu0 %v850_v12 }
  0x45   :  { %800 = vmatpush3.bf16.msra.mxu1 %v857_v62 }
  0x46   :  { %754 = vmatpush3.bf16.msra.mxu0 %v850_v12  ;;  %801 = vmatprep.subr.bf16.mxu1 %v858_v63 }
  0x49   :  { %756 = vmatmul.mubr.bf16.vlgmr.msra.gmra.mxu0 %v96_v19  ;;  %802 = vmatpush3.bf16.msra.mxu1 %v858_v63 }
  0x4a   :  { %759 = vmatprep.mubr.bf16.mxu0 %v97_v20 }
  0x51   :  { %760 = vmatmul.mubr.bf16.gmra.mxu0 %v98_v26 }
  0x52   :  { %763 = vmatprep.mubr.bf16.mxu0 %v99_v27 }
  0x59   :  { %764 = vmatmul.mubr.bf16.gmra.mxu0 %v100_v32 }
  0x5a   :  { %767 = vmatprep.mubr.bf16.mxu0 %v101_v33 }
  0x61   :  { %768 = vmatmul.mubr.bf16.gmra.mxu0 %v102_v38 }
  0x62   :  { %771 = vmatprep.mubr.bf16.mxu0 %v103_v39 }
  0x69   :  { %772 = vmatmul.mubr.bf16.gmra.mxu0 %v104_v44 }
  0x6a   :  { %775 = vmatprep.mubr.bf16.mxu0 %v105_v45 }
  0x71   :  { %776 = vmatmul.mubr.bf16.gmra.mxu0 %v106_v50 }
  0x72   :  { %779 = vmatprep.mubr.bf16.mxu0 %v107_v51 }
  0x79   :  { %780 = vmatmul.mubr.bf16.gmra.mxu0 %v108_v56 }
  0x7a   :  { %783 = vmatprep.mubr.bf16.mxu0 %v109_v57 }
  0x81   :  { %784 = vmatmul.mubr.bf16.gmra.mxu0 %v110_v60 }
 0x109   :  { %v757_v0 = vpop.f32.mrf.mxu0 }
 0x10a   :  { %v225_v6 = vadd.f32 %v757_v0, %v998_v2 }
 0x10b   :  { %v216_v1 = vpop.f32.mrf.mxu0 }
 0x10c   :  { %v217_v4 = vadd.f32 %v998_v2, %v216_v1  ;;  %v345_v13 = vmax.f32 %v225_v6, 0.0 }
 0x10d   :  { %v758_v3 = vpop.f32.mrf.mxu0 }
 0x10e   :  { %v228_v5 = vadd.f32 %v758_v3, %v998_v2  ;;  %v343_v11 = vmax.f32 %v217_v4, 0.0 }
 0x10f   :  { %v219_v7 = vpop.f32.mrf.mxu0 }
 0x110   :  { %v220_v8 = vadd.f32 %v998_v2, %v219_v7  ;;  %v346_v9 = vmax.f32 %v228_v5, 0.0 }
 0x111   :  { %v761_v10 = vpop.f32.mrf.mxu0 }
 0x112   :  { %v344_v12 = vmax.f32 %v220_v8, 0.0  ;;  %v376_v16 = vpack.c.bf16 %v346_v9, %v345_v13  ;;  %v241_v20 = vadd.f32 %v761_v10, %v998_v2 }
 0x113   :  { %v232_v14 = vpop.f32.mrf.mxu0 }
 0x114   :  { %v375_v15 = vpack.c.bf16 %v344_v12, %v343_v11  ;;  %v233_v18 = vadd.f32 %v998_v2, %v232_v14  ;;  %v349_v27 = vmax.f32 %v241_v20, 0.0 }
 0x115   :  { %v762_v17 = vpop.f32.mrf.mxu0 }
 0x116   :  { %v244_v19 = vadd.f32 %v762_v17, %v998_v2  ;;  %803 = vmatprep.mubr.bf16.mxu1 %v375_v15  ;;  %v347_v25 = vmax.f32 %v233_v18, 0.0 }
 0x117   :  { %v235_v21 = vpop.f32.mrf.mxu0  ;;  %804 = vmatmul.mubr.bf16.vlgmr.msra.gmra.mxu1 %v376_v16 }
 0x118   :  { %v236_v22 = vadd.f32 %v998_v2, %v235_v21  ;;  %v350_v23 = vmax.f32 %v244_v19, 0.0 }
 0x119   :  { %v765_v24 = vpop.f32.mrf.mxu0 }
 0x11a   :  { %v348_v26 = vmax.f32 %v236_v22, 0.0  ;;  %v378_v30 = vpack.c.bf16 %v350_v23, %v349_v27  ;;  %v257_v34 = vadd.f32 %v765_v24, %v998_v2 }
 0x11b   :  { %v248_v28 = vpop.f32.mrf.mxu0 }
 0x11c   :  { %v377_v29 = vpack.c.bf16 %v348_v26, %v347_v25  ;;  %v249_v32 = vadd.f32 %v998_v2, %v248_v28  ;;  %v353_v41 = vmax.f32 %v257_v34, 0.0 }
 0x11d   :  { %v766_v31 = vpop.f32.mrf.mxu0 }
 0x11e   :  { %v260_v33 = vadd.f32 %v766_v31, %v998_v2  ;;  %807 = vmatprep.mubr.bf16.mxu1 %v377_v29  ;;  %v351_v39 = vmax.f32 %v249_v32, 0.0 }
 0x11f   :  { %v251_v35 = vpop.f32.mrf.mxu0  ;;  %808 = vmatmul.mubr.bf16.gmra.mxu1 %v378_v30 }
 0x120   :  { %v252_v36 = vadd.f32 %v998_v2, %v251_v35  ;;  %v354_v37 = vmax.f32 %v260_v33, 0.0 }
 0x121   :  { %v769_v38 = vpop.f32.mrf.mxu0 }
 0x122   :  { %v352_v40 = vmax.f32 %v252_v36, 0.0  ;;  %v380_v44 = vpack.c.bf16 %v354_v37, %v353_v41  ;;  %v273_v48 = vadd.f32 %v769_v38, %v998_v2 }
 0x123   :  { %v264_v42 = vpop.f32.mrf.mxu0 }
 0x124   :  { %v379_v43 = vpack.c.bf16 %v352_v40, %v351_v39  ;;  %v265_v46 = vadd.f32 %v998_v2, %v264_v42  ;;  %v357_v55 = vmax.f32 %v273_v48, 0.0 }
 0x125   :  { %v770_v45 = vpop.f32.mrf.mxu0 }
 0x126   :  { %v276_v47 = vadd.f32 %v770_v45, %v998_v2  ;;  %811 = vmatprep.mubr.bf16.mxu1 %v379_v43  ;;  %v355_v53 = vmax.f32 %v265_v46, 0.0 }
 0x127   :  { %v267_v49 = vpop.f32.mrf.mxu0  ;;  %812 = vmatmul.mubr.bf16.gmra.mxu1 %v380_v44 }
 0x128   :  { %v268_v50 = vadd.f32 %v998_v2, %v267_v49  ;;  %v358_v51 = vmax.f32 %v276_v47, 0.0 }
 0x129   :  { %v773_v52 = vpop.f32.mrf.mxu0 }
 0x12a   :  { %v356_v54 = vmax.f32 %v268_v50, 0.0  ;;  %v382_v58 = vpack.c.bf16 %v358_v51, %v357_v55  ;;  %v289_v62 = vadd.f32 %v773_v52, %v998_v2  ;;  %v1035_v50 = vld [vmem:[%s1079_s4] ss:$0 sm:$0xff]  ;;  %s952_s4 = smov [#allocation8]  }
 0x12b   :  { %v280_v56 = vpop.f32.mrf.mxu0  ;;  %s660_s12 = sshll.u32 %s952_s4, 4  ;;  %s661_s12 = int_to_ptr.vmem [resolvable:$true] %s660_s12 }
 0x12c   :  { %v381_v57 = vpack.c.bf16 %v356_v54, %v355_v53  ;;  %v281_v60 = vadd.f32 %v998_v2, %v280_v56  ;;  %v361_v6 = vmax.f32 %v289_v62, 0.0  ;;  %s919_s13 = scalar_lea.vmem %s661_s12, 4096  ;;  %p924_p2 = scmp.lt.s32.totalorder %s661_s12, %s661_s12 }
 0x12d   :  { %v774_v59 = vpop.f32.mrf.mxu0  ;;  %p920_p1 = scmp.ne.s32.totalorder %s661_s12, %s919_s13  ;;  %p925_p3 = scmp.lt.s32.totalorder %s919_s13, %s919_s13 }
 0x12e   :  { %v292_v61 = vadd.f32 %v774_v59, %v998_v2  ;;  %815 = vmatprep.mubr.bf16.mxu1 %v381_v57  ;;  %v359_v4 = vmax.f32 %v281_v60, 0.0 }
 0x12f   :  { %v283_v63 = vpop.f32.mrf.mxu0  ;;  %816 = vmatmul.mubr.bf16.gmra.mxu1 %v382_v58  ;;  %p926_p4 = por %p925_p3, %p924_p2 }
 0x130   :  { %v284_v0 = vadd.f32 %v998_v2, %v283_v63  ;;  %v362_v1 = vmax.f32 %v292_v61, 0.0 }
 0x131   :  { %v777_v3 = vpop.f32.mrf.mxu0  ;;  %p927_p5 = pnand %p926_p4, %p920_p1 }
 0x132   :  { %v360_v5 = vmax.f32 %v284_v0, 0.0  ;;  %v384_v9 = vpack.c.bf16 %v362_v1, %v361_v6  ;;  %v305_v13 = vadd.f32 %v777_v3, %v998_v2 }
 0x133   :  { %v296_v7 = vpop.f32.mrf.mxu0 }
 0x134   :  { %v383_v8 = vpack.c.bf16 %v360_v5, %v359_v4  ;;  %v297_v11 = vadd.f32 %v998_v2, %v296_v7  ;;  %v365_v20 = vmax.f32 %v305_v13, 0.0 }
 0x135   :  { %v778_v10 = vpop.f32.mrf.mxu0 }
 0x136   :  { %v308_v12 = vadd.f32 %v778_v10, %v998_v2  ;;  %819 = vmatprep.mubr.bf16.mxu1 %v383_v8  ;;  %v363_v18 = vmax.f32 %v297_v11, 0.0 }
 0x137   :  { %v299_v14 = vpop.f32.mrf.mxu0  ;;  %820 = vmatmul.mubr.bf16.gmra.mxu1 %v384_v9 }
 0x138   :  { %v300_v15 = vadd.f32 %v998_v2, %v299_v14  ;;  %v366_v16 = vmax.f32 %v308_v12, 0.0 }
 0x139   :  { %v781_v17 = vpop.f32.mrf.mxu0 }
 0x13a   :  { %v364_v19 = vmax.f32 %v300_v15, 0.0  ;;  %v386_v23 = vpack.c.bf16 %v366_v16, %v365_v20  ;;  %v321_v27 = vadd.f32 %v781_v17, %v998_v2 }
 0x13b   :  { %v312_v21 = vpop.f32.mrf.mxu0 }
 0x13c   :  { %v385_v22 = vpack.c.bf16 %v364_v19, %v363_v18  ;;  %v313_v25 = vadd.f32 %v998_v2, %v312_v21  ;;  %v369_v34 = vmax.f32 %v321_v27, 0.0 }
 0x13d   :  { %v782_v24 = vpop.f32.mrf.mxu0 }
 0x13e   :  { %v324_v26 = vadd.f32 %v782_v24, %v998_v2  ;;  %823 = vmatprep.mubr.bf16.mxu1 %v385_v22  ;;  %v367_v32 = vmax.f32 %v313_v25, 0.0 }
 0x13f   :  { %v315_v28 = vpop.f32.mrf.mxu0  ;;  %824 = vmatmul.mubr.bf16.gmra.mxu1 %v386_v23 }
 0x140   :  { %v316_v29 = vadd.f32 %v998_v2, %v315_v28  ;;  %v370_v30 = vmax.f32 %v324_v26, 0.0 }
 0x141   :  { %v785_v31 = vpop.f32.mrf.mxu0 }
 0x142   :  { %v368_v33 = vmax.f32 %v316_v29, 0.0  ;;  %v388_v37 = vpack.c.bf16 %v370_v30, %v369_v34  ;;  %v337_v41 = vadd.f32 %v785_v31, %v998_v2 }
 0x143   :  { %v328_v35 = vpop.f32.mrf.mxu0 }
 0x144   :  { %v387_v36 = vpack.c.bf16 %v368_v33, %v367_v32  ;;  %v329_v39 = vadd.f32 %v998_v2, %v328_v35  ;;  %v373_v47 = vmax.f32 %v337_v41, 0.0 }
 0x145   :  { %v786_v38 = vpop.f32.mrf.mxu0 }
 0x146   :  { %v340_v40 = vadd.f32 %v786_v38, %v998_v2  ;;  %827 = vmatprep.mubr.bf16.mxu1 %v387_v36  ;;  %v371_v45 = vmax.f32 %v329_v39, 0.0 }
 0x147   :  { %v331_v42 = vpop.f32.mrf.mxu0  ;;  %828 = vmatmul.mubr.bf16.gmra.mxu1 %v388_v37 }
 0x148   :  { %v332_v43 = vadd.f32 %v998_v2, %v331_v42  ;;  %v374_v44 = vmax.f32 %v340_v40, 0.0 }
 0x14a   :  { %v372_v46 = vmax.f32 %v332_v43, 0.0  ;;  %v390_v49 = vpack.c.bf16 %v374_v44, %v373_v47 }
 0x14c   :  { %v389_v48 = vpack.c.bf16 %v372_v46, %v371_v45 }
 0x14e   :  { %831 = vmatprep.mubr.bf16.mxu1 %v389_v48 }
 0x14f   :  { %832 = vmatmul.mubr.bf16.gmra.mxu1 %v390_v49 }
 0x1d7   :  { %v805_v51 = vpop.f32.mrf.mxu1 }
 0x1d8   :  { %v505_v52 = vadd.f32 %v805_v51, %v1035_v50 }
 0x1d9   :  { %v496_v53 = vpop.f32.mrf.mxu1 }
 0x1da   :  { %625 = vst [vmem:[#allocation8 + $0x10] sm:$0xff] %v505_v52  ;;  %v497_v2 = vadd.f32 %v1035_v50, %v496_v53 }
 0x1db   :  { %v806_v54 = vpop.f32.mrf.mxu1 }
 0x1dc   :  { %623 = vst [vmem:[#allocation8] sm:$0xff] %v497_v2  ;;  %v508_v55 = vadd.f32 %v806_v54, %v1035_v50 }
 0x1dd   :  { %v499_v56 = vpop.f32.mrf.mxu1 }
 0x1de   :  { %626 = vst [vmem:[#allocation8 + $0x18] sm:$0xff] %v508_v55  ;;  %v500_v57 = vadd.f32 %v1035_v50, %v499_v56 }
 0x1df   :  { %v809_v58 = vpop.f32.mrf.mxu1 }
 0x1e0   :  { %624 = vst [vmem:[#allocation8 + $0x8] sm:$0xff] %v500_v57  ;;  %v521_v59 = vadd.f32 %v809_v58, %v1035_v50 }
 0x1e1   :  { %v512_v60 = vpop.f32.mrf.mxu1 }
 0x1e2   :  { %629 = vst [vmem:[#allocation8 + $0x30] sm:$0xff] %v521_v59  ;;  %v513_v61 = vadd.f32 %v1035_v50, %v512_v60 }
 0x1e3   :  { %v810_v62 = vpop.f32.mrf.mxu1 }
 0x1e4   :  { %627 = vst [vmem:[#allocation8 + $0x20] sm:$0xff] %v513_v61  ;;  %v524_v63 = vadd.f32 %v810_v62, %v1035_v50 }
 0x1e5   :  { %v515_v0 = vpop.f32.mrf.mxu1 }
 0x1e6   :  { %630 = vst [vmem:[#allocation8 + $0x38] sm:$0xff] %v524_v63  ;;  %v516_v1 = vadd.f32 %v1035_v50, %v515_v0 }
 0x1e7   :  { %v813_v3 = vpop.f32.mrf.mxu1 }
 0x1e8   :  { %628 = vst [vmem:[#allocation8 + $0x28] sm:$0xff] %v516_v1  ;;  %v537_v4 = vadd.f32 %v813_v3, %v1035_v50 }
 0x1e9   :  { %v528_v5 = vpop.f32.mrf.mxu1 }
 0x1ea   :  { %633 = vst [vmem:[#allocation8 + $0x50] sm:$0xff] %v537_v4  ;;  %v529_v6 = vadd.f32 %v1035_v50, %v528_v5 }
 0x1eb   :  { %v814_v7 = vpop.f32.mrf.mxu1 }
 0x1ec   :  { %631 = vst [vmem:[#allocation8 + $0x40] sm:$0xff] %v529_v6  ;;  %v540_v8 = vadd.f32 %v814_v7, %v1035_v50 }
 0x1ed   :  { %v531_v9 = vpop.f32.mrf.mxu1 }
 0x1ee   :  { %634 = vst [vmem:[#allocation8 + $0x58] sm:$0xff] %v540_v8  ;;  %v532_v10 = vadd.f32 %v1035_v50, %v531_v9 }
 0x1ef   :  { %v817_v11 = vpop.f32.mrf.mxu1 }
 0x1f0   :  { %632 = vst [vmem:[#allocation8 + $0x48] sm:$0xff] %v532_v10  ;;  %v553_v12 = vadd.f32 %v817_v11, %v1035_v50 }
 0x1f1   :  { %v544_v13 = vpop.f32.mrf.mxu1 }
 0x1f2   :  { %637 = vst [vmem:[#allocation8 + $0x70] sm:$0xff] %v553_v12  ;;  %v545_v14 = vadd.f32 %v1035_v50, %v544_v13 }
 0x1f3   :  { %v818_v15 = vpop.f32.mrf.mxu1 }
 0x1f4   :  { %635 = vst [vmem:[#allocation8 + $0x60] sm:$0xff] %v545_v14  ;;  %v556_v16 = vadd.f32 %v818_v15, %v1035_v50 }
 0x1f5   :  { %v547_v17 = vpop.f32.mrf.mxu1 }
 0x1f6   :  { %638 = vst [vmem:[#allocation8 + $0x78] sm:$0xff] %v556_v16  ;;  %v548_v18 = vadd.f32 %v1035_v50, %v547_v17 }
 0x1f7   :  { %v821_v19 = vpop.f32.mrf.mxu1 }
 0x1f8   :  { %636 = vst [vmem:[#allocation8 + $0x68] sm:$0xff] %v548_v18  ;;  %v569_v20 = vadd.f32 %v821_v19, %v1035_v50 }
 0x1f9   :  { %v560_v21 = vpop.f32.mrf.mxu1 }
 0x1fa   :  { %641 = vst [vmem:[#allocation8 + $0x90] sm:$0xff] %v569_v20  ;;  %v561_v22 = vadd.f32 %v1035_v50, %v560_v21 }
 0x1fb   :  { %v822_v23 = vpop.f32.mrf.mxu1 }
 0x1fc   :  { %639 = vst [vmem:[#allocation8 + $0x80] sm:$0xff] %v561_v22  ;;  %v572_v24 = vadd.f32 %v822_v23, %v1035_v50 }
 0x1fd   :  { %v563_v25 = vpop.f32.mrf.mxu1 }
 0x1fe   :  { %642 = vst [vmem:[#allocation8 + $0x98] sm:$0xff] %v572_v24  ;;  %v564_v26 = vadd.f32 %v1035_v50, %v563_v25 }
 0x1ff   :  { %v825_v27 = vpop.f32.mrf.mxu1 }
 0x200   :  { %640 = vst [vmem:[#allocation8 + $0x88] sm:$0xff] %v564_v26  ;;  %v585_v28 = vadd.f32 %v825_v27, %v1035_v50 }
 0x201   :  { %v576_v29 = vpop.f32.mrf.mxu1 }
 0x202   :  { %645 = vst [vmem:[#allocation8 + $0xb0] sm:$0xff] %v585_v28  ;;  %v577_v30 = vadd.f32 %v1035_v50, %v576_v29 }
 0x203   :  { %v826_v31 = vpop.f32.mrf.mxu1 }
 0x204   :  { %643 = vst [vmem:[#allocation8 + $0xa0] sm:$0xff] %v577_v30  ;;  %v588_v32 = vadd.f32 %v826_v31, %v1035_v50 }
 0x205   :  { %v579_v33 = vpop.f32.mrf.mxu1 }
 0x206   :  { %646 = vst [vmem:[#allocation8 + $0xb8] sm:$0xff] %v588_v32  ;;  %v580_v34 = vadd.f32 %v1035_v50, %v579_v33 }
 0x207   :  { %v829_v35 = vpop.f32.mrf.mxu1 }
 0x208   :  { %644 = vst [vmem:[#allocation8 + $0xa8] sm:$0xff] %v580_v34  ;;  %v601_v36 = vadd.f32 %v829_v35, %v1035_v50 }
 0x209   :  { %v592_v37 = vpop.f32.mrf.mxu1 }
 0x20a   :  { %649 = vst [vmem:[#allocation8 + $0xd0] sm:$0xff] %v601_v36  ;;  %v593_v38 = vadd.f32 %v1035_v50, %v592_v37 }
 0x20b   :  { %v830_v39 = vpop.f32.mrf.mxu1 }
 0x20c   :  { %647 = vst [vmem:[#allocation8 + $0xc0] sm:$0xff] %v593_v38  ;;  %v604_v40 = vadd.f32 %v830_v39, %v1035_v50 }
 0x20d   :  { %v595_v41 = vpop.f32.mrf.mxu1 }
 0x20e   :  { %650 = vst [vmem:[#allocation8 + $0xd8] sm:$0xff] %v604_v40  ;;  %v596_v42 = vadd.f32 %v1035_v50, %v595_v41 }
 0x20f   :  { %v833_v43 = vpop.f32.mrf.mxu1 }
 0x210   :  { %648 = vst [vmem:[#allocation8 + $0xc8] sm:$0xff] %v596_v42  ;;  %v617_v44 = vadd.f32 %v833_v43, %v1035_v50 }
 0x211   :  { %v608_v45 = vpop.f32.mrf.mxu1 }
 0x212   :  { %653 = vst [vmem:[#allocation8 + $0xf0] sm:$0xff] %v617_v44  ;;  %v609_v46 = vadd.f32 %v1035_v50, %v608_v45 }
 0x213   :  { %v834_v47 = vpop.f32.mrf.mxu1 }
 0x214   :  { %651 = vst [vmem:[#allocation8 + $0xe0] sm:$0xff] %v609_v46  ;;  %v620_v48 = vadd.f32 %v834_v47, %v1035_v50 }
 0x215   :  { %v611_v49 = vpop.f32.mrf.mxu1 }
 0x216   :  { %654 = vst [vmem:[#allocation8 + $0xf8] sm:$0xff] %v620_v48  ;;  %v612_v51 = vadd.f32 %v1035_v50, %v611_v49 }
 0x218   :  { %652 = vst [vmem:[#allocation8 + $0xe8] sm:$0xff] %v612_v51 }
 0x219   :  { %930 = shalt.err (!%p927_p5)
}
 0x21a   :  { %666 = dma.vmem_to_hbm [thread:$0]  %s661_s12, 4096, %s1080_s5, [#allocation4], %s949_s28, %s949_s28, %s950_s29  }
 0x21b   :  { %943 = dma.done.wait [#allocation4], 4096  }
 0x21c   :  { %944 = vsyncadd [#allocation4], 4294963200 }
 0x21d   :  { %670 = vsyncpa [#allocation3], 1 }
 0x21e   :  { %671 = vsyncpa [#allocation6], 1 }
 0x21f   :  { %672 = vsyncpa [#allocation4], 1 }

</bundles_post_ra>
